<compile_context>
chip_gen: v7x
topology: tpu7x:2x2x1
jax: 0.10.0
libtpu: 0.0.40
codegen_flags: <defaults>
</compile_context>

<pallas_src>
import jax
import jax.numpy as jnp
import numpy as np
from jax.experimental import pallas as pl
from jax.experimental.pallas import tpu as pltpu


# ------------------------------- kernel --------------------------------------
def _make_last_part_kernel(cin, oc, tr, width):
  trw = tr * width

  def kernel(x_ref, w_ref, b_ref, lm_ref, rm_ref, o_ref):
    # x_ref : (Cin, (TR+2)*W + 2) bf16  row-padded tile, pixels flattened
    # w_ref : (OC, 9*Cin)         bf16  fully folded weights
    # b_ref : (OC, 1)             f32   fully folded bias
    # lm/rm : (1, TR*W)           bf16  width-pad masks (kw=0 / kw=2 taps)
    # o_ref : (OC, TR*W)          f32
    x = x_ref[...]
    lm = lm_ref[...]
    rm = rm_ref[...]

    # In-VMEM im2col: tap (kh, kw) of output pixel (r, c) lives at flattened
    # input lane (r + kh)*W + (c + kw - 1) + 1 = lane + kh*W + kw, so every
    # tap is one contiguous lane slice.  kw=0 / kw=2 taps wrap across row
    # ends; the true conv value there is the zero pad, so mask those lanes.
    parts = []
    for kh in range(3):
      for kw in range(3):
        s = kh * width + kw
        p = x[:, s:s + trw]                       # (Cin, TR*W)
        if kw == 0:
          p = p * lm
        elif kw == 2:
          p = p * rm
        parts.append(p)
    patches = jnp.concatenate(parts, axis=0)      # (9*Cin, TR*W)

    # Single fused contraction: last_conv ∘ BN2 ∘ conv2 ∘ BN1 ∘ conv1.
    y = jnp.dot(w_ref[...], patches,
                preferred_element_type=jnp.float32) + b_ref[...]

    if oc == 1:
      out = 0.5 * jnp.tanh(0.5 * y) + 0.5          # sigmoid, one EUP op
    else:
      m = jnp.max(y, axis=0, keepdims=True)
      e = jnp.exp(y - m)
      out = e * pl.reciprocal(jnp.sum(e, axis=0, keepdims=True), approx=True)

    o_ref[...] = out.astype(o_ref.dtype)

  return kernel


# ------------------------------- wrapper --------------------------------------
def _fold_params(p, compute_dtype=jnp.bfloat16):
  """Fold BN + all three linear stages into one (OC, 9*Cin) matmul + bias."""
  kh, kw, cin, c = p["w1"].shape
  oc = p["w3"].shape[-1]
  w1 = (p["w1"] * p["s1"]).reshape(kh * kw * cin, c).T        # (C, 9*Cin)
  b1 = p["b1"].reshape(c, 1)
  w2 = (p["w2"] * p["s2"][None, :]).T                          # (C, C)
  b2 = p["b2"].reshape(c, 1)
  w3 = p["w3"].T                                               # (OC, C)
  b3 = p["b3"].reshape(oc, 1)
  w_full = w3 @ w2 @ w1                                        # (OC, 9*Cin) f32
  b_full = w3 @ (w2 @ b1 + b2) + b3                            # (OC, 1)     f32
  return w_full.astype(compute_dtype), b_full.astype(jnp.float32)


def _choose_row_tile(h, w, target_lanes=2048):
  """Largest row-tile TR dividing H with TR*W a 128-multiple within budget."""
  budget = max(128, min(target_lanes, (h * w) // 2))
  best = None
  for tr in range(1, h + 1):
    if h % tr:
      continue
    lanes = tr * w
    if lanes % 128 == 0 and lanes <= budget:
      best = tr
  return best if best is not None else h   # fallback: one tile (full dims)


@jax.jit
def last_part(x_nchw, params):
  """x_nchw: (N, Cin, H, W) float32.  Returns (N, OC, H, W) float32."""
  n, cin, h, w = x_nchw.shape
  oc = params["w3"].shape[-1]
  k9 = 9 * cin

  tr = _choose_row_tile(h, w)
  t = h // tr
  trw = tr * w
  tile_len = (tr + 2) * w + 2

  w_full, b_full = _fold_params(params)

  # Raw activation: bf16, rows zero-padded by 1 (SAME), pixels flattened.
  xb = x_nchw.astype(jnp.bfloat16)
  xp = jnp.pad(xb, ((0, 0), (0, 0), (1, 1), (0, 0)))            # (N,Cin,H+2,W)
  xf = xp.reshape(n, cin, (h + 2) * w)
  # Row tiles with a 1-row halo each side (+1 zero lane front/back so all 9
  # tap slices stay in range).  ~2/TR relative overhead vs 9x for im2col.
  tiles = [xf[:, :, i * trw: i * trw + (tr + 2) * w] for i in range(t)]
  x_tiles = jnp.stack(tiles, axis=1)                            # (N,T,Cin,(TR+2)W)
  x_tiles = jnp.pad(x_tiles, ((0, 0), (0, 0), (0, 0), (1, 1)))  # (N,T,Cin,tile_len)

  # Width "SAME"-padding masks for the kw=0 / kw=2 taps.
  col = np.arange(trw) % w
  lmask = jnp.asarray((col != 0).astype(np.float32),
                      dtype=jnp.bfloat16).reshape(1, trw)
  rmask = jnp.asarray((col != w - 1).astype(np.float32),
                      dtype=jnp.bfloat16).reshape(1, trw)

  grid_spec = pltpu.PrefetchScalarGridSpec(
      num_scalar_prefetch=0,
      grid=(n, t),
      in_specs=[
          pl.BlockSpec((None, None, cin, tile_len), lambda i, j: (i, j, 0, 0)),
          pl.BlockSpec((oc, k9), lambda i, j: (0, 0)),
          pl.BlockSpec((oc, 1), lambda i, j: (0, 0)),
          pl.BlockSpec((1, trw), lambda i, j: (0, 0)),
          pl.BlockSpec((1, trw), lambda i, j: (0, 0)),
      ],
      out_specs=pl.BlockSpec((None, oc, trw), lambda i, j: (i, 0, j)),
  )

  cost = pl.CostEstimate(
      flops=2 * oc * k9 * n * h * w,
      transcendentals=n * h * w * oc,
      bytes_accessed=int(n * t * cin * tile_len * 2
                         + n * oc * h * w * 4 + oc * k9 * 2))

  out_flat = pl.pallas_call(
      _make_last_part_kernel(cin, oc, tr, w),
      out_shape=jax.ShapeDtypeStruct((n, oc, h * w), jnp.float32),
      grid_spec=grid_spec,
      compiler_params=pltpu.CompilerParams(
          dimension_semantics=("parallel", "parallel")),
      cost_estimate=cost,
  )(x_tiles, w_full, b_full, lmask, rmask)

  # (N, OC, H*W) -> (N, OC, H, W): free row-major reshape in the wrapper.
  return out_flat.reshape(n, oc, h, w)


# ----------------------------- parameter setup --------------------------------
def _fold_bn(gamma, beta, mean, var, eps=1e-5):
  scale = gamma / jnp.sqrt(var + eps)
  bias = beta - mean * scale
  return scale, bias


def make_params(key, in_planes, planes, out_channels=1):
  ks = jax.random.split(key, 6)

  w1 = jax.random.normal(ks[0], (3, 3, in_planes, planes),
                         jnp.float32) / np.sqrt(9 * in_planes)
  w2 = jax.random.normal(ks[1], (planes, planes),
                         jnp.float32) / np.sqrt(planes)
  w3 = jax.random.normal(ks[2], (planes, out_channels),
                         jnp.float32) / np.sqrt(planes)
  b3 = 0.1 * jax.random.normal(ks[3], (out_channels,), jnp.float32)

  def bn(k, c):
    k0, k1, k2, k3 = jax.random.split(k, 4)
    gamma = 1.0 + 0.1 * jax.random.normal(k0, (c,), jnp.float32)
    beta = 0.1 * jax.random.normal(k1, (c,), jnp.float32)
    mean = 0.1 * jax.random.normal(k2, (c,), jnp.float32)
    var = 1.0 + 0.1 * jax.random.uniform(k3, (c,), jnp.float32)
    return _fold_bn(gamma, beta, mean, var)

  s1, b1 = bn(ks[4], planes)
  s2, b2 = bn(ks[5], planes)

  return dict(w1=w1, s1=s1, b1=b1, w2=w2, s2=s2, b2=b2, w3=w3, b3=b3)


# ----------------------------- pure-JAX reference ------------------------------
def last_part_ref(x_nchw, p):
  x = jnp.transpose(x_nchw, (0, 2, 3, 1))                 # NHWC, f32 throughout
  y = jax.lax.conv_general_dilated(
      x, p["w1"], window_strides=(1, 1), padding="SAME",
      dimension_numbers=("NHWC", "HWIO", "NHWC"))
  y = y * p["s1"] + p["b1"]
  y = jnp.einsum("nhwc,cd->nhwd", y, p["w2"]) * p["s2"] + p["b2"]
  y = jnp.einsum("nhwc,co->nhwo", y, p["w3"]) + p["b3"]
  oc = p["w3"].shape[-1]
  if oc == 1:
    y = 1.0 / (1.0 + jnp.exp(-y))
  else:
    y = jax.nn.softmax(y, axis=-1)
  return jnp.transpose(y, (0, 3, 1, 2))                   # NCHW


if __name__ == "__main__":
  N, Cin, C, OC, H, W = 2, 4, 8, 1, 16, 16
  key = jax.random.PRNGKey(0)
  kx, kp = jax.random.split(key)

  x_nchw = jax.random.normal(kx, (N, Cin, H, W), jnp.float32)
  params = make_params(kp, Cin, C, out_channels=OC)

  out = last_part(x_nchw, params)
  out = jax.block_until_ready(out)

  ref = last_part_ref(x_nchw, params)
  # Tolerance relaxed vs pure-f32: fused weights/activations hit the MXU in
  # bf16 with f32 accumulation.
  np.testing.assert_allclose(np.asarray(out), np.asarray(ref),
                             rtol=2e-2, atol=2e-2)
  print("KERNEL_OK")
</pallas_src>

<mosaic_0001>
module attributes {stable_mosaic.version = 11 : i64} {
  func.func @kernel(%arg0: i32, %arg1: i32, %arg2: memref<1x1x4x162xbf16, #tpu.memory_space<vmem>>, %arg3: memref<1x36xbf16, #tpu.memory_space<vmem>>, %arg4: memref<1x1xf32, #tpu.memory_space<vmem>>, %arg5: memref<1x128xbf16, #tpu.memory_space<vmem>>, %arg6: memref<1x128xbf16, #tpu.memory_space<vmem>>, %arg7: memref<1x1x128xf32, #tpu.memory_space<vmem>>) attributes {dimension_semantics = [#tpu.dimension_semantics<parallel>, #tpu.dimension_semantics<parallel>], iteration_bounds = array<i64: 2, 2>, scalar_prefetch = 0 : i64, scratch_operands = 0 : i64, tpu.core_type = #tpu.core_type<tc>, window_params = [{transform_indices = @transform_0, window_bounds = array<i64: 1, 1, 4, 162>}, {pipeline_mode = #tpu.pipeline_mode<synchronous>, transform_indices = @transform_1, window_bounds = array<i64: 1, 36>}, {pipeline_mode = #tpu.pipeline_mode<synchronous>, transform_indices = @transform_2, window_bounds = array<i64: 1, 1>}, {pipeline_mode = #tpu.pipeline_mode<synchronous>, transform_indices = @transform_3, window_bounds = array<i64: 1, 128>}, {pipeline_mode = #tpu.pipeline_mode<synchronous>, transform_indices = @transform_4, window_bounds = array<i64: 1, 128>}, {transform_indices = @transform_5, window_bounds = array<i64: 1, 1, 128>}]} {
    %c0 = arith.constant 0 : index
    %c0_0 = arith.constant 0 : index
    %c0_1 = arith.constant 0 : index
    %c0_2 = arith.constant 0 : index
    %0 = vector.load %arg2[%c0, %c0_0, %c0_1, %c0_2] : memref<1x1x4x162xbf16, #tpu.memory_space<vmem>>, vector<1x1x4x162xbf16>
    %1 = vector.shape_cast %0 : vector<1x1x4x162xbf16> to vector<4x162xbf16>
    %c0_3 = arith.constant 0 : index
    %c0_4 = arith.constant 0 : index
    %2 = vector.load %arg5[%c0_3, %c0_4] : memref<1x128xbf16, #tpu.memory_space<vmem>>, vector<1x128xbf16>
    %c0_5 = arith.constant 0 : index
    %c0_6 = arith.constant 0 : index
    %3 = vector.load %arg6[%c0_5, %c0_6] : memref<1x128xbf16, #tpu.memory_space<vmem>>, vector<1x128xbf16>
    %4 = vector.extract_strided_slice %1 {offsets = [0, 0], sizes = [4, 128], strides = [1, 1]} : vector<4x162xbf16> to vector<4x128xbf16>
    %5 = vector.broadcast %2 : vector<1x128xbf16> to vector<4x128xbf16>
    %6 = arith.mulf %4, %5 : vector<4x128xbf16>
    %7 = vector.extract_strided_slice %1 {offsets = [0, 1], sizes = [4, 128], strides = [1, 1]} : vector<4x162xbf16> to vector<4x128xbf16>
    %8 = vector.extract_strided_slice %1 {offsets = [0, 2], sizes = [4, 128], strides = [1, 1]} : vector<4x162xbf16> to vector<4x128xbf16>
    %9 = vector.broadcast %3 : vector<1x128xbf16> to vector<4x128xbf16>
    %10 = arith.mulf %8, %9 : vector<4x128xbf16>
    %11 = vector.extract_strided_slice %1 {offsets = [0, 16], sizes = [4, 128], strides = [1, 1]} : vector<4x162xbf16> to vector<4x128xbf16>
    %12 = vector.broadcast %2 : vector<1x128xbf16> to vector<4x128xbf16>
    %13 = arith.mulf %11, %12 : vector<4x128xbf16>
    %14 = vector.extract_strided_slice %1 {offsets = [0, 17], sizes = [4, 128], strides = [1, 1]} : vector<4x162xbf16> to vector<4x128xbf16>
    %15 = vector.extract_strided_slice %1 {offsets = [0, 18], sizes = [4, 128], strides = [1, 1]} : vector<4x162xbf16> to vector<4x128xbf16>
    %16 = vector.broadcast %3 : vector<1x128xbf16> to vector<4x128xbf16>
    %17 = arith.mulf %15, %16 : vector<4x128xbf16>
    %18 = vector.extract_strided_slice %1 {offsets = [0, 32], sizes = [4, 128], strides = [1, 1]} : vector<4x162xbf16> to vector<4x128xbf16>
    %19 = vector.broadcast %2 : vector<1x128xbf16> to vector<4x128xbf16>
    %20 = arith.mulf %18, %19 : vector<4x128xbf16>
    %21 = vector.extract_strided_slice %1 {offsets = [0, 33], sizes = [4, 128], strides = [1, 1]} : vector<4x162xbf16> to vector<4x128xbf16>
    %22 = vector.extract_strided_slice %1 {offsets = [0, 34], sizes = [4, 128], strides = [1, 1]} : vector<4x162xbf16> to vector<4x128xbf16>
    %23 = vector.broadcast %3 : vector<1x128xbf16> to vector<4x128xbf16>
    %24 = arith.mulf %22, %23 : vector<4x128xbf16>
    %25 = tpu.concatenate %6, %7, %10, %13, %14, %17, %20, %21, %24 in 0 : vector<4x128xbf16>, vector<4x128xbf16>, vector<4x128xbf16>, vector<4x128xbf16>, vector<4x128xbf16>, vector<4x128xbf16>, vector<4x128xbf16>, vector<4x128xbf16>, vector<4x128xbf16> -> vector<36x128xbf16>
    %c0_7 = arith.constant 0 : index
    %c0_8 = arith.constant 0 : index
    %26 = vector.load %arg3[%c0_7, %c0_8] : memref<1x36xbf16, #tpu.memory_space<vmem>>, vector<1x36xbf16>
    %cst = arith.constant dense<0.000000e+00> : vector<1x128xf32>
    %27 = tpu.matmul %26, %25, %cst {dimension_numbers = #tpu.dot_dimension_numbers<[1], [0], [0], [1], [0, 0, 1, 1], [], []>} : vector<1x36xbf16>, vector<36x128xbf16>, vector<1x128xf32> -> vector<1x128xf32>
    %c0_9 = arith.constant 0 : index
    %c0_10 = arith.constant 0 : index
    %28 = vector.load %arg4[%c0_9, %c0_10] : memref<1x1xf32, #tpu.memory_space<vmem>>, vector<1x1xf32>
    %29 = vector.broadcast %28 : vector<1x1xf32> to vector<1x128xf32>
    %30 = arith.addf %27, %29 : vector<1x128xf32>
    %cst_11 = arith.constant 5.000000e-01 : f32
    %31 = vector.broadcast %cst_11 : f32 to vector<1x128xf32>
    %32 = arith.mulf %31, %30 : vector<1x128xf32>
    %33 = math.tanh %32 : vector<1x128xf32>
    %cst_12 = arith.constant 5.000000e-01 : f32
    %34 = vector.broadcast %cst_12 : f32 to vector<1x128xf32>
    %35 = arith.mulf %34, %33 : vector<1x128xf32>
    %cst_13 = arith.constant 5.000000e-01 : f32
    %36 = vector.broadcast %cst_13 : f32 to vector<1x128xf32>
    %37 = arith.addf %35, %36 : vector<1x128xf32>
    %c0_14 = arith.constant 0 : index
    %c0_15 = arith.constant 0 : index
    %c0_16 = arith.constant 0 : index
    %38 = vector.load %arg7[%c0_14, %c0_15, %c0_16] : memref<1x1x128xf32, #tpu.memory_space<vmem>>, vector<1x1x128xf32>
    %39 = vector.shape_cast %38 : vector<1x1x128xf32> to vector<1x128xf32>
    %40 = vector.shape_cast %37 : vector<1x128xf32> to vector<1x1x128xf32>
    tpu.vector_store %arg7[%c0_14, %c0_15, %c0_16], %40 {strides = array<i32>} : memref<1x1x128xf32, #tpu.memory_space<vmem>>, vector<1x1x128xf32>,
    return
  }
  func.func @transform_0(%arg0: i32, %arg1: i32) -> (i32, i32, i32, i32) {
    %c0_i32 = arith.constant 0 : i32
    %c0_i32_0 = arith.constant 0 : i32
    %c0_i32_1 = arith.constant 0 : i32
    return %arg0, %arg1, %c0_i32, %c0_i32_0 : i32, i32, i32, i32
  }
  func.func @transform_1(%arg0: i32, %arg1: i32) -> (i32, i32) {
    %c0_i32 = arith.constant 0 : i32
    %c0_i32_0 = arith.constant 0 : i32
    %c0_i32_1 = arith.constant 0 : i32
    return %c0_i32, %c0_i32_0 : i32, i32
  }
  func.func @transform_2(%arg0: i32, %arg1: i32) -> (i32, i32) {
    %c0_i32 = arith.constant 0 : i32
    %c0_i32_0 = arith.constant 0 : i32
    %c0_i32_1 = arith.constant 0 : i32
    return %c0_i32, %c0_i32_0 : i32, i32
  }
  func.func @transform_3(%arg0: i32, %arg1: i32) -> (i32, i32) {
    %c0_i32 = arith.constant 0 : i32
    %c0_i32_0 = arith.constant 0 : i32
    %c0_i32_1 = arith.constant 0 : i32
    return %c0_i32, %c0_i32_0 : i32, i32
  }
  func.func @transform_4(%arg0: i32, %arg1: i32) -> (i32, i32) {
    %c0_i32 = arith.constant 0 : i32
    %c0_i32_0 = arith.constant 0 : i32
    %c0_i32_1 = arith.constant 0 : i32
    return %c0_i32, %c0_i32_0 : i32, i32
  }
  func.func @transform_5(%arg0: i32, %arg1: i32) -> (i32, i32, i32) {
    %c0_i32 = arith.constant 0 : i32
    %c0_i32_0 = arith.constant 0 : i32
    return %arg0, %c0_i32, %arg1 : i32, i32, i32
  }
}

</mosaic_0001>

<bundles_post_ra>
// kernel: last_part.1
= control target key start
LH: loop header
LB: loop body
LE: loop exit
PB: predicated region body
PF: predicated region fallthrough
CT: control target
= control target key end

     0   :  { %s786_s20 = smov 0   ;;  %s788_s21 = smov 0   ;;  %s904_s0 = inlined_call_operand.vmem [shape: bf16[2,2,4,162], index: 0, kind: input, shape index: {}]   ;;  %s905_s1 = inlined_call_operand.vmem [shape: bf16[1,36], index: 1, kind: input, shape index: {}]   ;;  %s906_s2 = inlined_call_operand.<no memory space> [shape: f32[1,1], index: 2, kind: input, shape index: {}]   ;;  %s907_s3 = inlined_call_operand.vmem [shape: bf16[1,128], index: 3, kind: input, shape index: {}]   ;;  %s908_s4 = inlined_call_operand.vmem [shape: bf16[1,128], index: 4, kind: input, shape index: {}]   ;;  %s909_s5 = inlined_call_operand.vmem [shape: f32[2,1,256], index: 5, kind: output, shape index: {}]  }
   0x1   :  { %v10_v0 = vstv %s906_s2  ;;  %s790_s22 = smov 0   ;;  %s792_s23 = smov 0  }
   0x2   :  { %11 = vst [vmem:[#allocation2] sm:$0x1] %v10_v0  ;;  %s794_s24 = smov 0  }
   0x3 LB: > { %s26_s2 = sadd.s32 1, %s726_s22  ;;  %s29_s25 = sadd.s32 1, %s730_s23  ;;  %s734_s24 = sphi %s794_s24, %s17_s24   ;;  %s730_s23 = sphi %s792_s23, %s913_s23   ;;  %s726_s22 = sphi %s790_s22, %s912_s22   ;;  %s722_s21 = sphi %s788_s21, %s911_s21   ;;  %s718_s20 = sphi %s786_s20, %s910_s20  }
   0x4   : > { %p27_p0 = scmp.ge.s32.totalorder %s26_s2, 2  ;;  %p612_p1 = scmp.ge.s32.totalorder %s734_s24, 1 }
   0x5   : > { %p209_p2 = scmp.lt.s32.totalorder %s734_s24, 5 }
   0x6   : > { %s915_s2 = smov (%p27_p0, %s26_s2), 0  ;;  %s917_s25 = smov (!%p27_p0, %s29_s25), %s730_s23 }
   0x7   : > { %p210_p3 = pnand %p612_p1, %p209_p2  ;;  %p31_p4 = scmp.ge.s32.totalorder %s917_s25, 2 }
   0x8   : > { %v261_v1 = vld [vmem:[%s907_s3] sm:$0x1] (!%p210_p3)  ;;  %v266_v2 = vlaneseq (!%p210_p3)  ;;  %p243_p5 = scmp.lt.s32.totalorder (!%p210_p3), %s722_s21, 1  ;;  %v736_v3 = vmov (!%p210_p3), 1983009808   ;;  %p245_p6 = scmp.lt.s32.totalorder (!%p210_p3), %s718_s20, 1 }
   0x9   : > { %s919_s25 = smov (%p31_p4, %s917_s25), 0  ;;  %213 = sbr.rel (%p210_p3) target bundleno = 518 (0x206), region = 40 }
   0xa   : > { %v280_v4 = vunpack.c.l.s4 (!%p210_p3), %v736_v3  ;;  %v262_v5 = vld [vmem:[%s908_s4] sm:$0x1] (!%p210_p3)  ;;  %v264_v6 = vpack.i.b16 (!%p210_p3), %v261_v1, %v261_v1  ;;  %v267_v7 = vshrl.u32 (!%p210_p3), %v266_v2, 7  ;;  %s737_s12 = smov (!%p210_p3), 16   ;;  %s738_s13 = smov (!%p210_p3), 18   ;;  %vm311_vm0 = vcmask (!%p210_p3), 146432  }
   0xb   : > { %v272_v8 = vpack.i.b16 (!%p210_p3), %v262_v5, %v262_v5  ;;  %s739_s14 = smov (!%p210_p3), 2   ;;  %s740_s15 = smov (!%p210_p3), 32   ;;  %vm304_vm1 = vcmask (!%p210_p3), 130048   ;;  %vm289_vm2 = vcmask (!%p210_p3), 15360   ;;  %vm318_vm3 = vcmask (!%p210_p3), 261120  }
   0xc   : > { %v281_v9 = vunpack.c.0.s8 (!%p210_p3), %v280_v4  ;;  %v826_v10 = vsub.s32 (!%p210_p3), 0, %v267_v7  ;;  %s741_s16 = smov (!%p210_p3), 34   ;;  %s742_s17 = smov (!%p210_p3), 111   ;;  %vm325_vm4 = vcmask (!%p210_p3), 277504   ;;  %v745_v45 = vmov (!%p210_p3), 0.0  }
   0xd   : > { %s743_s18 = smov (!%p210_p3), 127   ;;  %s744_s19 = smov (!%p210_p3), 126   ;;  %624 = vmatprep.subr.bf16.mxu0 (!%p210_p3), %v745_v45  ;;  %vm749_vm5 = vmmov (!%p210_p3), 0   ;;  %v750_v55 = vmov (!%p210_p3), 0   ;;  %v463_v57 = vld [vmem:[#allocation2] sm:$0x1] (!%p210_p3) }
   0xe   : > { %v829_v11 = vsub.s32 (!%p210_p3), %v281_v9, %v267_v7  ;;  %v833_v12 = vrot.slane (!%p210_p3), %v264_v6, %v826_v10  ;;  %v277_v13 = vrot.slane (!%p210_p3), %v272_v8, %v826_v10  ;;  %s746_s26 = smov (!%p210_p3), 96   ;;  %s747_s27 = smov (!%p210_p3), 110   ;;  %630 = vmatprep.mubr.msk.bf16.mxu0 (!%p210_p3), %vm749_vm5, %v745_v45  ;;  %691 = vset.pattern.permute.xlu1 (!%p210_p3), %v750_v55  ;;  %vm350_vm6 = vcmask (!%p210_p3), 1039360  }
   0xf   : > { %s748_s28 = smov (!%p210_p3), 112   ;;  %692 = vset.pattern.permute.xlu0 (!%p210_p3), %v750_v55  ;;  %s751_s29 = smov (!%p210_p3), 95   ;;  %vm365_vm7 = vcmask (!%p210_p3), 1031168   ;;  %vm404_vm8 = vcmask (!%p210_p3), 900096   ;;  %vm443_vm9 = vcmask (!%p210_p3), 1041408   ;;  %vm388_vm10 = vcmask (!%p210_p3), 908288  }
  0x10   : > { %s921_s21 = smov (!%p243_p5, %s722_s21), 1  ;;  %s923_s20 = smov (!%p245_p6, %s718_s20), 1  ;;  %v300_v14 = vrot.slane %v833_v12, %v829_v11  ;;  %v285_v15 = vrot.slane %v277_v13, %v829_v11  ;;  %vm381_vm11 = vcmask 916480   ;;  %vm447_vm12 = vcmask 1043456  }
  0x11   : > { %s614_s30 = sshll.u32 %s921_s21, 2  ;;  %s613_s6 = sshll.u32 %s923_s20, 1  ;;  %vm450_vm13 = vcmask 1045504   ;;  %vm419_vm14 = vcmask 785408   ;;  %vm426_vm15 = vcmask 777216  }
  0x12   : > { %s249_s7 = sadd.s32 %s614_s30, %s613_s6  ;;  %301 = vrot.lane.b32.xlu0 %v300_v14, %s737_s12  ;;  %308 = vrot.lane.b32.xlu1 %v285_v15, %s738_s13  ;;  %s752_s30 = smov 94  }
  0x13   : > { %s615_s8 = sshll.u32 %s249_s7, 1 }
  0x14   : > { %s251_s11 = scalar_lea.vmem %s904_s0, %s615_s8  ;;  %s616_s8 = sshll.u32 %s921_s21, 1 }
  0x15   : > { %v842_v16 = vld [vmem:[%s251_s11] sm:$0xf]  ;;  %s257_s9 = sadd.s32 %s616_s8, %s923_s20 }
  0x16   : > { %v330_v17 = vcombine.low %v842_v16, %v842_v16  ;;  %286 = vrot.lane.b32.xlu0 %v285_v15, %s739_s14  ;;  %315 = vrot.lane.b32.xlu1 %v300_v14, %s740_s15  ;;  %v344_v18 = vrot.slane %v842_v16, %v829_v11  ;;  %v270_v3 = vmul.bf16 %v833_v12, %v842_v16  ;;  %s258_s12 = scalar_lea.vmem %s909_s5, %s257_s9 }
  0x18   : > { %v849_v19 = vrot.slane %v330_v17, %v829_v11  ;;  %v383_v21 = vcombine.high %v344_v18, %v344_v18 }
  0x1a   : > { %322 = vrot.lane.b32.xlu0 %v285_v15, %s741_s16  ;;  %384 = vrot.lane.b32.xlu1 %v344_v18, %s742_s17  ;;  %v345_v20 = vcombine.high %v849_v19, %v849_v19  ;;  %v421_v54 = vcombine.low %v849_v19, %v849_v19 }
  0x1e   : > { %348 = vrot.lane.b32.xlu0 %v345_v20, %s743_s18  ;;  %346 = vrot.lane.b32.xlu1 %v849_v19, %s743_s18 }
  0x22   : > { %386 = vrot.lane.b32.xlu0 %v383_v21, %s742_s17 }
  0x84   : > { %v302_v22 = vpop.permute.xlu0 %301  ;;  %v309_v23 = vpop.permute.xlu1 %308 }
  0x85   : > { %v310_v24 = vrot.slane %v309_v23, 6  ;;  %v303_v25 = vrot.slane %v302_v22, 6 }
  0x87   : > { %v312_v28 = vsel %vm311_vm0, %v310_v24, %v309_v23  ;;  %v305_v31 = vsel %vm304_vm1, %v303_v25, %v302_v22  ;;  %vm441_vm0 = vcmask 769024   ;;  %vm473_vm1 = vcmask 293888  }
  0x88   : > { %v287_v26 = vpop.permute.xlu0 %286  ;;  %v316_v27 = vpop.permute.xlu1 %315  ;;  %v314_v34 = vmul.bf16 %v312_v28, %v842_v16  ;;  %v307_v37 = vmul.bf16 %v305_v31, %v842_v16 }
  0x89   : > { %v288_v29 = vrot.slane %v287_v26, 6  ;;  %v317_v30 = vrot.slane %v316_v27, 6 }
  0x8a   : > { %v391_v40 = vcombine.low %v314_v34, %v314_v34  ;;  %v368_v44 = vcombine.low %v307_v37, %v307_v37 }
  0x8b   : > { %v290_v32 = vsel %vm289_vm2, %v288_v29, %v287_v26  ;;  %v319_v33 = vsel %vm318_vm3, %v317_v30, %v316_v27  ;;  %v462_v27 = vld [vmem:[%s905_s1] sm:$0x1] }
  0x8c   : > { %v292_v35 = vmul.bf16 %v290_v32, %v842_v16  ;;  %v321_v36 = vmul.bf16 %v319_v33, %v842_v16  ;;  %v323_v39 = vpop.permute.xlu0 %322  ;;  %v398_v46 = vrot.slane %v391_v40, %v829_v11  ;;  %v375_v48 = vrot.slane %v368_v44, %v829_v11  ;;  %v385_v59 = vpop.permute.xlu1 %384 }
  0x8d   : > { %v324_v43 = vrot.slane %v323_v39, 6 }
  0x8e   : > { %v359_v38 = vrot.slane %v292_v35, %v829_v11  ;;  %v413_v42 = vrot.slane %v321_v36, %v829_v11  ;;  %v399_v51 = vcombine.high %v398_v46, %v398_v46  ;;  %v376_v53 = vcombine.low %v375_v48, %v375_v48 }
  0x8f   : > { %v326_v47 = vsel %vm325_vm4, %v324_v43, %v323_v39 }
  0x90   : > { %363 = vrot.lane.b32.xlu0 %v359_v38, %s744_s19  ;;  %v360_v41 = vcombine.low %v359_v38, %v359_v38  ;;  %v328_v49 = vmul.bf16 %v326_v47, %v842_v16  ;;  %v414_v50 = vcombine.low %v413_v42, %v413_v42  ;;  %v349_v58 = vpop.permute.xlu0 %348  ;;  %v347_v61 = vpop.permute.xlu1 %346 }
  0x91   : > { %v351_v5 = vsel %vm350_vm6, %v347_v61, %v349_v58 }
  0x92   : > { %361 = vrot.lane.b32.xlu1 %v360_v41, %s744_s19  ;;  %v435_v52 = vrot.slane %v328_v49, %v829_v11  ;;  %v446_v9 = vsel %vm443_vm9, %v270_v3, %v351_v5 }
  0x94   : > { %417 = vrot.lane.b32.xlu0 %v413_v42, %s746_s26  ;;  %v436_v56 = vcombine.high %v435_v52, %v435_v52  ;;  %v387_v60 = vpop.permute.xlu0 %386 }
  0x95   : > { %v389_v13 = vsel %vm388_vm10, %v385_v59, %v387_v60 }
  0x96   : > { %400 = vrot.lane.b32.xlu1 %v398_v46, %s747_s27 }
  0x98   : > { %379 = vrot.lane.b32.xlu0 %v375_v48, %s748_s28 }
  0x9a   : > { %415 = vrot.lane.b32.xlu1 %v414_v50, %s746_s26 }
  0x9c   : > { %402 = vrot.lane.b32.xlu0 %v399_v51, %s747_s27 }
  0x9e   : > { %377 = vrot.lane.b32.xlu1 %v376_v53, %s748_s28 }
  0xa0   : > { %424 = vrot.lane.b32.xlu0 %v849_v19, %s751_s29 }
  0xa2   : > { %422 = vrot.lane.b32.xlu1 %v421_v54, %s751_s29 }
  0xa4   : > { %439 = vrot.lane.b32.xlu0 %v436_v56, %s752_s30 }
  0xa6   : > { %437 = vrot.lane.b32.xlu1 %v435_v52, %s752_s30 }
  0xaa   : > { %466 = vperm.xlu1 %691, %v463_v57  }
 0x102   : > { %v364_v62 = vpop.permute.xlu0 %363 }
 0x104   : > { %v362_v63 = vpop.permute.xlu1 %361 }
 0x105   : > { %v366_v6 = vsel %vm365_vm7, %v362_v63, %v364_v62 }
 0x106   : > { %v418_v0 = vpop.permute.xlu0 %417  ;;  %v449_v15 = vsel %vm447_vm12, %v446_v9, %v366_v6 }
 0x108   : > { %v401_v1 = vpop.permute.xlu1 %400 }
 0x10a   : > { %v380_v2 = vpop.permute.xlu0 %379 }
 0x10c   : > { %v416_v4 = vpop.permute.xlu1 %415 }
 0x10d   : > { %v420_v18 = vsel %vm419_vm14, %v416_v4, %v418_v0 }
 0x10e   : > { %v403_v7 = vpop.permute.xlu0 %402 }
 0x10f   : > { %v405_v8 = vsel %vm404_vm8, %v401_v1, %v403_v7 }
 0x110   : > { %v378_v11 = vpop.permute.xlu1 %377  ;;  %v456_v12 = vsel %vm443_vm9, %v389_v13, %v405_v8 }
 0x111   : > { %v382_v14 = vsel %vm381_vm11, %v378_v11, %v380_v2  ;;  %v458_v21 = vsel %vm447_vm12, %v456_v12, %v420_v18 }
 0x112   : > { %v425_v16 = vpop.permute.xlu0 %424  ;;  %v452_v17 = vsel %vm450_vm13, %v449_v15, %v382_v14 }
 0x113   : > { %625 = vmatpush3.bf16.msra.mxu0 %v452_v17 }
 0x114   : > { %v423_v19 = vpop.permute.xlu1 %422  ;;  %626 = vmatprep.subr.bf16.mxu0 %v745_v45 }
 0x115   : > { %v427_v20 = vsel %vm426_vm15, %v423_v19, %v425_v16 }
 0x116   : > { %v460_v22 = vsel %vm450_vm13, %v458_v21, %v427_v20  ;;  %v440_v23 = vpop.permute.xlu0 %439 }
 0x117   : > { %627 = vmatpush3.bf16.msra.mxu0 %v460_v22 }
 0x118   : > { %v438_v24 = vpop.permute.xlu1 %437  ;;  %628 = vmatprep.subr.bf16.mxu0 %v745_v45 }
 0x119   : > { %v442_v25 = vsel %vm441_vm0, %v438_v24, %v440_v23 }
 0x11a   : > { %v478_v26 = vsel %vm443_vm9, %v442_v25, 0 }
 0x11b   : > { %629 = vmatpush3.bf16.msra.mxu0 %v478_v26 }
 0x11e   : > { %631 = vmatmul.mubr.msk.bf16.vlgmr.msra.gmra.mrb[0].mxu0 %vm473_vm1, %v462_v27 }
 0x129   : > { %v467_v28 = vpop.permute.xlu1 %466 }
 0x12a   : > { %v472_v29 = vrot.slane %v467_v28, %v826_v10 }
 0x1f1   : > { %v514_v30 = vpop.f32.mrb[0].mxu0 }
 0x1f2   : > { %v515_v31 = vadd.f32 %v514_v30, %v472_v29  ;;  %v632_v32 = vpop.f32.mrb[1].mxu0 }
 0x1f3   : > { %v517_v33 = vpop.f32.mrb[2].mxu0 }
 0x1f4   : > { %v520_v34 = vmul.f32 0.5, %v515_v31  ;;  %v633_v35 = vpop.f32.mrb[3].mxu0 }
 0x1f6   : > { %694 = vtanh.f32 %v520_v34 }
 0x200   : > { %v695_v36 = vpop.eup %694 }
 0x201   : > { %v522_v37 = vmul.f32 0.5, %v695_v36 }
 0x203   : > { %v523_v38 = vadd.f32 0.5, %v522_v37 }
 0x205   : > { %524 = vst [vmem:[%s258_s12] sm:$0x1] %v523_v38 }
 0x206 PF: > { %s17_s24 = sadd.s32 1, %s734_s24   ;;  %s910_s20 = smov %s726_s22 }
 0x207   : > { %p14_p7 = scmp.ge.s32.totalorder %s17_s24, 6   ;;  %s911_s21 = smov %s730_s23 }
 0x208   : > { %s912_s22 = smov %s915_s2  ;;  %s913_s23 = smov %s919_s25 }
 0x209   :  { %16 = sbr.rel (!%p14_p7) target bundleno = 3 (0x3), region = 70 }

</bundles_post_ra>
